<compile_context>
chip_gen: v7x
topology: tpu7x:2x2x1
jax: 0.10.0
libtpu: 0.0.40
codegen_flags: <defaults>
</compile_context>

<pallas_src>
import math

import jax
import jax.numpy as jnp
import numpy as np
from jax.experimental import pallas as pl
from jax.experimental.pallas import tpu as pltpu


def _vmem_spec():
    return pl.BlockSpec(memory_space=pltpu.MemorySpace.VMEM)


# --------------------------------------------------------------------------- #
# Fused whole-model Pallas kernel
# --------------------------------------------------------------------------- #
def build_fused_forward_kernel(types, adj_types, target_type, num_layers):
    """Build a kernel computing the full VN-HGCN forward for a fixed graph
    structure (types / adj_types / num_layers are trace-time constants)."""
    types = list(types)
    adj_pairs = [(j, k) for j in types for k in adj_types[j]]

    def kernel(*refs):
        it = iter(refs)
        x_refs = {j: next(it) for j in types}
        adj_refs = {p: next(it) for p in adj_pairs}
        w_self_refs = [{j: next(it) for j in types} for _ in range(num_layers)]
        w_sem_refs = [{p: next(it) for p in adj_pairs}
                      for _ in range(num_layers)]
        w_cls_ref = next(it)
        emb_ref = next(it)
        pred_ref = next(it)

        # Node features stay resident in VMEM/vregs for the whole forward pass.
        h = {j: x_refs[j][...] for j in types}
        cdt = h[types[0]].dtype          # compute dtype (bf16 in production)

        last_f32 = None
        for i in range(num_layers):
            new_f32 = {}
            for j in types:
                # self transform:  (Nj, D) @ (D, H) -> (Nj, H), f32 accumulate
                z = jnp.dot(h[j], w_self_refs[i][j][...],
                            preferred_element_type=jnp.float32)
                for k in adj_types[j]:
                    # semantic transform of neighbor features
                    z_sem = jnp.dot(h[k], w_sem_refs[i][(j, k)][...],
                                    preferred_element_type=jnp.float32)
                    # densified sparse.mm:  (Nj, Nk) @ (Nk, H) -> (Nj, H)
                    z = z + jnp.dot(adj_refs[(j, k)][...],
                                    z_sem.astype(cdt),
                                    preferred_element_type=jnp.float32)
                # attention weights are provably 1.0 (softmax over a size-1
                # dim) -> plain sum + relu is exact.
                new_f32[j] = jnp.maximum(z, 0.0)
            h = {j: new_f32[j].astype(cdt) for j in types}
            last_f32 = new_f32

        emb = last_f32[target_type]                       # f32
        emb_ref[...] = emb

        # classify head: Linear(hidden -> C, no bias) + Softmax(dim=1)
        logits = jnp.dot(emb.astype(cdt), w_cls_ref[...],
                         preferred_element_type=jnp.float32)
        m = jnp.max(logits, axis=1, keepdims=True)
        e = jnp.exp(logits - m)
        pred_ref[...] = e / jnp.sum(e, axis=1, keepdims=True)

    return kernel


def _flatten_model_inputs(x, adj_m, params, types, adj_types, num_layers,
                          dtype):
    """Flatten inputs/weights in the exact order the kernel consumes them."""
    types = list(types)
    flat = [x[j].astype(dtype) for j in types]
    for j in types:
        for k in adj_types[j]:
            flat.append(adj_m[j][k].astype(dtype))
    for i in range(num_layers):
        for j in types:
            flat.append(params["layers"][i][j]["w_self"].astype(dtype))
    for i in range(num_layers):
        for j in types:
            for k in adj_types[j]:
                flat.append(params["layers"][i][j]["w_sem"][k].astype(dtype))
    flat.append(params["classify"].astype(dtype))
    return flat


def model_forward(x, adj_m, params, types, adj_types, target_type, num_layers,
                  compute_dtype=jnp.bfloat16):
    """Whole VN-HGCN forward in one pallas_call. Returns (emb, pred) in f32."""
    types = list(types)
    flat = _flatten_model_inputs(x, adj_m, params, types, adj_types,
                                 num_layers, compute_dtype)
    n_t = x[target_type].shape[0]
    hidden = params["classify"].shape[0]
    num_classes = params["classify"].shape[1]
    kernel = build_fused_forward_kernel(types, adj_types, target_type,
                                        num_layers)
    emb, pred = pl.pallas_call(
        kernel,
        out_shape=(jax.ShapeDtypeStruct((n_t, hidden), jnp.float32),
                   jax.ShapeDtypeStruct((n_t, num_classes), jnp.float32)),
        in_specs=[_vmem_spec()] * len(flat),
        out_specs=(_vmem_spec(), _vmem_spec()),
    )(*flat)
    return emb, pred


# --------------------------------------------------------------------------- #
# Pure-JAX reference (identical math / identical casting recipe)
# --------------------------------------------------------------------------- #
def reference_forward(x, adj_m, params, types, adj_types, target_type,
                      num_layers, compute_dtype=jnp.float32):
    cdt = compute_dtype
    h = {j: x[j].astype(cdt) for j in types}
    last_f32 = None
    for i in range(num_layers):
        new_f32 = {}
        for j in types:
            p = params["layers"][i][j]
            z = jnp.dot(h[j], p["w_self"].astype(cdt),
                        preferred_element_type=jnp.float32)
            for k in adj_types[j]:
                z_sem = jnp.dot(h[k], p["w_sem"][k].astype(cdt),
                                preferred_element_type=jnp.float32)
                z = z + jnp.dot(adj_m[j][k].astype(cdt), z_sem.astype(cdt),
                                preferred_element_type=jnp.float32)
            # softmax(att, dim=1) on an (M, 1) column == 1.0 everywhere.
            new_f32[j] = jnp.maximum(z, 0.0)
        h = {j: new_f32[j].astype(cdt) for j in types}
        last_f32 = new_f32
    emb = last_f32[target_type]
    logits = jnp.dot(emb.astype(cdt), params["classify"].astype(cdt),
                     preferred_element_type=jnp.float32)
    pred = jax.nn.softmax(logits, axis=1)
    return emb, pred


# --------------------------------------------------------------------------- #
# Deterministic parameter init (xavier_uniform, gain for relu = sqrt(2))
# --------------------------------------------------------------------------- #
def xavier_uniform(key, fan_in, fan_out, shape, gain=math.sqrt(2.0)):
    bound = gain * math.sqrt(6.0 / (fan_in + fan_out))
    return jax.random.uniform(key, shape, jnp.float32, -bound, bound)


if __name__ == "__main__":
    # Synthetic heterogeneous graph: two node types, each adjacent to the other.
    types = ["A", "B"]
    adj_types = {"A": ["B"], "B": ["A"]}
    types_num = {"A": 32, "B": 48}
    types_dim = {"A": 24, "B": 16}
    hidden_dim, att_dim, num_classes, num_layers = 32, 16, 4, 2
    target_type = "A"

    key = jax.random.PRNGKey(0)
    keys = iter(jax.random.split(key, 128))

    # Node features.
    x = {j: jax.random.normal(next(keys), (types_num[j], types_dim[j]),
                              jnp.float32) for j in types}

    # Dense (densified sparse-COO) adjacency with random values.
    adj_m = {}
    for j in types:
        adj_m[j] = {}
        for k in adj_types[j]:
            mask = (jax.random.uniform(next(keys),
                                       (types_num[j], types_num[k])) < 0.3)
            vals = jax.random.uniform(next(keys),
                                      (types_num[j], types_num[k]))
            adj_m[j][k] = (mask.astype(jnp.float32) * vals).astype(jnp.float32)

    # Parameters (attention params are intentionally NOT created: the attention
    # branch is mathematically the identity and has been elided).
    params = {"layers": []}
    for i in range(num_layers):
        layer = {}
        for j in types:
            in_self = types_dim[j] if i == 0 else hidden_dim
            p = {
                "w_self": xavier_uniform(next(keys), in_self, hidden_dim,
                                         (in_self, hidden_dim)),
                "w_sem": {},
            }
            for k in adj_types[j]:
                in_sem = types_dim[k] if i == 0 else hidden_dim
                p["w_sem"][k] = xavier_uniform(next(keys), in_sem, hidden_dim,
                                               (in_sem, hidden_dim))
            layer[j] = p
        params["layers"].append(layer)
    params["classify"] = xavier_uniform(next(keys), hidden_dim, num_classes,
                                        (hidden_dim, num_classes))

    # ---- exact-precision check: Pallas (f32) vs f32 spec reference ---------- #
    emb32, pred32 = model_forward(x, adj_m, params, types, adj_types,
                                  target_type, num_layers,
                                  compute_dtype=jnp.float32)
    emb32 = jax.block_until_ready(emb32)
    pred32 = jax.block_until_ready(pred32)
    emb_ref32, pred_ref32 = reference_forward(x, adj_m, params, types,
                                              adj_types, target_type,
                                              num_layers,
                                              compute_dtype=jnp.float32)
    assert emb32.shape == (types_num[target_type], hidden_dim)
    assert pred32.shape == (types_num[target_type], num_classes)
    np.testing.assert_allclose(np.asarray(emb32), np.asarray(emb_ref32),
                               rtol=1e-4, atol=1e-4)
    np.testing.assert_allclose(np.asarray(pred32), np.asarray(pred_ref32),
                               rtol=1e-4, atol=1e-4)

    # ---- production precision: Pallas (bf16 operands, f32 accumulate) ------- #
    emb_bf, pred_bf = model_forward(x, adj_m, params, types, adj_types,
                                    target_type, num_layers,
                                    compute_dtype=jnp.bfloat16)
    emb_bf = jax.block_until_ready(emb_bf)
    pred_bf = jax.block_until_ready(pred_bf)
    emb_ref_bf, pred_ref_bf = reference_forward(x, adj_m, params, types,
                                                adj_types, target_type,
                                                num_layers,
                                                compute_dtype=jnp.bfloat16)
    np.testing.assert_allclose(np.asarray(emb_bf), np.asarray(emb_ref_bf),
                               rtol=2e-3, atol=2e-3)
    np.testing.assert_allclose(np.asarray(pred_bf), np.asarray(pred_ref_bf),
                               rtol=2e-3, atol=2e-3)

    # Informative only: how far the bf16 path drifts from the f32 spec.
    emb_drift = float(np.max(np.abs(np.asarray(emb_bf) - np.asarray(emb_ref32))))
    pred_drift = float(np.max(np.abs(np.asarray(pred_bf) - np.asarray(pred_ref32))))
    print(f"bf16 vs f32-spec max drift: emb={emb_drift:.4e} pred={pred_drift:.4e}")

    print("KERNEL_OK")
</pallas_src>

<mosaic_0001>
module attributes {stable_mosaic.version = 11 : i64} {
  func.func @kernel(%arg0: memref<32x24xf32, #tpu.memory_space<vmem>>, %arg1: memref<48x16xf32, #tpu.memory_space<vmem>>, %arg2: memref<32x48xf32, #tpu.memory_space<vmem>>, %arg3: memref<48x32xf32, #tpu.memory_space<vmem>>, %arg4: memref<24x32xf32, #tpu.memory_space<vmem>>, %arg5: memref<16x32xf32, #tpu.memory_space<vmem>>, %arg6: memref<32x32xf32, #tpu.memory_space<vmem>>, %arg7: memref<32x32xf32, #tpu.memory_space<vmem>>, %arg8: memref<16x32xf32, #tpu.memory_space<vmem>>, %arg9: memref<24x32xf32, #tpu.memory_space<vmem>>, %arg10: memref<32x32xf32, #tpu.memory_space<vmem>>, %arg11: memref<32x32xf32, #tpu.memory_space<vmem>>, %arg12: memref<32x4xf32, #tpu.memory_space<vmem>>, %arg13: memref<32x32xf32, #tpu.memory_space<vmem>>, %arg14: memref<32x4xf32, #tpu.memory_space<vmem>>) attributes {dimension_semantics = [], scalar_prefetch = 0 : i64, scratch_operands = 0 : i64, tpu.core_type = #tpu.core_type<tc>} {
    %c0 = arith.constant 0 : index
    %c0_0 = arith.constant 0 : index
    %0 = vector.load %arg0[%c0, %c0_0] : memref<32x24xf32, #tpu.memory_space<vmem>>, vector<32x24xf32>
    %c0_1 = arith.constant 0 : index
    %c0_2 = arith.constant 0 : index
    %1 = vector.load %arg1[%c0_1, %c0_2] : memref<48x16xf32, #tpu.memory_space<vmem>>, vector<48x16xf32>
    %c0_3 = arith.constant 0 : index
    %c0_4 = arith.constant 0 : index
    %2 = vector.load %arg4[%c0_3, %c0_4] : memref<24x32xf32, #tpu.memory_space<vmem>>, vector<24x32xf32>
    %cst = arith.constant dense<0.000000e+00> : vector<32x32xf32>
    %3 = tpu.matmul %0, %2, %cst {dimension_numbers = #tpu.dot_dimension_numbers<[1], [0], [0], [1], [0, 0, 1, 1], [], []>} : vector<32x24xf32>, vector<24x32xf32>, vector<32x32xf32> -> vector<32x32xf32>
    %c0_5 = arith.constant 0 : index
    %c0_6 = arith.constant 0 : index
    %4 = vector.load %arg8[%c0_5, %c0_6] : memref<16x32xf32, #tpu.memory_space<vmem>>, vector<16x32xf32>
    %cst_7 = arith.constant dense<0.000000e+00> : vector<48x32xf32>
    %5 = tpu.matmul %1, %4, %cst_7 {dimension_numbers = #tpu.dot_dimension_numbers<[1], [0], [0], [1], [0, 0, 1, 1], [], []>} : vector<48x16xf32>, vector<16x32xf32>, vector<48x32xf32> -> vector<48x32xf32>
    %c0_8 = arith.constant 0 : index
    %c0_9 = arith.constant 0 : index
    %6 = vector.load %arg2[%c0_8, %c0_9] : memref<32x48xf32, #tpu.memory_space<vmem>>, vector<32x48xf32>
    %cst_10 = arith.constant dense<0.000000e+00> : vector<32x32xf32>
    %7 = tpu.matmul %6, %5, %cst_10 {dimension_numbers = #tpu.dot_dimension_numbers<[1], [0], [0], [1], [0, 0, 1, 1], [], []>} : vector<32x48xf32>, vector<48x32xf32>, vector<32x32xf32> -> vector<32x32xf32>
    %8 = arith.addf %3, %7 : vector<32x32xf32>
    %cst_11 = arith.constant 0.000000e+00 : f32
    %9 = vector.broadcast %cst_11 : f32 to vector<32x32xf32>
    %10 = arith.maximumf %8, %9 : vector<32x32xf32>
    %c0_12 = arith.constant 0 : index
    %c0_13 = arith.constant 0 : index
    %11 = vector.load %arg5[%c0_12, %c0_13] : memref<16x32xf32, #tpu.memory_space<vmem>>, vector<16x32xf32>
    %cst_14 = arith.constant dense<0.000000e+00> : vector<48x32xf32>
    %12 = tpu.matmul %1, %11, %cst_14 {dimension_numbers = #tpu.dot_dimension_numbers<[1], [0], [0], [1], [0, 0, 1, 1], [], []>} : vector<48x16xf32>, vector<16x32xf32>, vector<48x32xf32> -> vector<48x32xf32>
    %c0_15 = arith.constant 0 : index
    %c0_16 = arith.constant 0 : index
    %13 = vector.load %arg9[%c0_15, %c0_16] : memref<24x32xf32, #tpu.memory_space<vmem>>, vector<24x32xf32>
    %cst_17 = arith.constant dense<0.000000e+00> : vector<32x32xf32>
    %14 = tpu.matmul %0, %13, %cst_17 {dimension_numbers = #tpu.dot_dimension_numbers<[1], [0], [0], [1], [0, 0, 1, 1], [], []>} : vector<32x24xf32>, vector<24x32xf32>, vector<32x32xf32> -> vector<32x32xf32>
    %c0_18 = arith.constant 0 : index
    %c0_19 = arith.constant 0 : index
    %15 = vector.load %arg3[%c0_18, %c0_19] : memref<48x32xf32, #tpu.memory_space<vmem>>, vector<48x32xf32>
    %cst_20 = arith.constant dense<0.000000e+00> : vector<48x32xf32>
    %16 = tpu.matmul %15, %14, %cst_20 {dimension_numbers = #tpu.dot_dimension_numbers<[1], [0], [0], [1], [0, 0, 1, 1], [], []>} : vector<48x32xf32>, vector<32x32xf32>, vector<48x32xf32> -> vector<48x32xf32>
    %17 = arith.addf %12, %16 : vector<48x32xf32>
    %cst_21 = arith.constant 0.000000e+00 : f32
    %18 = vector.broadcast %cst_21 : f32 to vector<48x32xf32>
    %19 = arith.maximumf %17, %18 : vector<48x32xf32>
    %c0_22 = arith.constant 0 : index
    %c0_23 = arith.constant 0 : index
    %20 = vector.load %arg6[%c0_22, %c0_23] : memref<32x32xf32, #tpu.memory_space<vmem>>, vector<32x32xf32>
    %cst_24 = arith.constant dense<0.000000e+00> : vector<32x32xf32>
    %21 = tpu.matmul %10, %20, %cst_24 {dimension_numbers = #tpu.dot_dimension_numbers<[1], [0], [0], [1], [0, 0, 1, 1], [], []>} : vector<32x32xf32>, vector<32x32xf32>, vector<32x32xf32> -> vector<32x32xf32>
    %c0_25 = arith.constant 0 : index
    %c0_26 = arith.constant 0 : index
    %22 = vector.load %arg10[%c0_25, %c0_26] : memref<32x32xf32, #tpu.memory_space<vmem>>, vector<32x32xf32>
    %cst_27 = arith.constant dense<0.000000e+00> : vector<48x32xf32>
    %23 = tpu.matmul %19, %22, %cst_27 {dimension_numbers = #tpu.dot_dimension_numbers<[1], [0], [0], [1], [0, 0, 1, 1], [], []>} : vector<48x32xf32>, vector<32x32xf32>, vector<48x32xf32> -> vector<48x32xf32>
    %c0_28 = arith.constant 0 : index
    %c0_29 = arith.constant 0 : index
    %24 = vector.load %arg2[%c0_28, %c0_29] : memref<32x48xf32, #tpu.memory_space<vmem>>, vector<32x48xf32>
    %cst_30 = arith.constant dense<0.000000e+00> : vector<32x32xf32>
    %25 = tpu.matmul %24, %23, %cst_30 {dimension_numbers = #tpu.dot_dimension_numbers<[1], [0], [0], [1], [0, 0, 1, 1], [], []>} : vector<32x48xf32>, vector<48x32xf32>, vector<32x32xf32> -> vector<32x32xf32>
    %26 = arith.addf %21, %25 : vector<32x32xf32>
    %cst_31 = arith.constant 0.000000e+00 : f32
    %27 = vector.broadcast %cst_31 : f32 to vector<32x32xf32>
    %28 = arith.maximumf %26, %27 : vector<32x32xf32>
    %c0_32 = arith.constant 0 : index
    %c0_33 = arith.constant 0 : index
    %29 = vector.load %arg13[%c0_32, %c0_33] : memref<32x32xf32, #tpu.memory_space<vmem>>, vector<32x32xf32>
    tpu.vector_store %arg13[%c0_32, %c0_33], %28 {strides = array<i32>} : memref<32x32xf32, #tpu.memory_space<vmem>>, vector<32x32xf32>,
    %c0_34 = arith.constant 0 : index
    %c0_35 = arith.constant 0 : index
    %30 = vector.load %arg12[%c0_34, %c0_35] : memref<32x4xf32, #tpu.memory_space<vmem>>, vector<32x4xf32>
    %cst_36 = arith.constant dense<0.000000e+00> : vector<32x4xf32>
    %31 = tpu.matmul %28, %30, %cst_36 {dimension_numbers = #tpu.dot_dimension_numbers<[1], [0], [0], [1], [0, 0, 1, 1], [], []>} : vector<32x32xf32>, vector<32x4xf32>, vector<32x4xf32> -> vector<32x4xf32>
    %cst_37 = arith.constant dense<0xFF800000> : vector<32xf32>
    %32 = vector.multi_reduction <maximumf>, %31, %cst_37 [1] : vector<32x4xf32> to vector<32xf32>
    %33 = vector.shape_cast %32 : vector<32xf32> to vector<32x1xf32>
    %34 = vector.broadcast %33 : vector<32x1xf32> to vector<32x4xf32>
    %35 = arith.subf %31, %34 : vector<32x4xf32>
    %36 = math.exp %35 : vector<32x4xf32>
    %cst_38 = arith.constant dense<0.000000e+00> : vector<32xf32>
    %37 = vector.multi_reduction <add>, %36, %cst_38 [1] : vector<32x4xf32> to vector<32xf32>
    %38 = vector.shape_cast %37 : vector<32xf32> to vector<32x1xf32>
    %39 = vector.broadcast %38 : vector<32x1xf32> to vector<32x4xf32>
    %40 = arith.divf %36, %39 : vector<32x4xf32>
    %c0_39 = arith.constant 0 : index
    %c0_40 = arith.constant 0 : index
    %41 = vector.load %arg14[%c0_39, %c0_40] : memref<32x4xf32, #tpu.memory_space<vmem>>, vector<32x4xf32>
    tpu.vector_store %arg14[%c0_39, %c0_40], %40 {strides = array<i32>} : memref<32x4xf32, #tpu.memory_space<vmem>>, vector<32x4xf32>,
    return
  }
}

</mosaic_0001>

<bundles_post_ra>
// kernel: tpu_custom_call.1
= control target key start
LH: loop header
LB: loop body
LE: loop exit
PB: predicated region body
PF: predicated region fallthrough
CT: control target
= control target key end

     0   :  { %20 = vsyncpa [#allocation3], 0  ;;  %s1989_s0 = inlined_call_operand.vmem [shape: f32[32,24], index: 0, kind: input, shape index: {}]   ;;  %s1990_s1 = inlined_call_operand.vmem [shape: f32[48,16], index: 1, kind: input, shape index: {}]   ;;  %s1991_s2 = inlined_call_operand.vmem [shape: f32[32,48], index: 2, kind: input, shape index: {}]   ;;  %s1992_s3 = inlined_call_operand.vmem [shape: f32[48,32], index: 3, kind: input, shape index: {}]   ;;  %s1993_s4 = inlined_call_operand.vmem [shape: f32[24,32], index: 4, kind: input, shape index: {}]   ;;  %s1994_s5 = inlined_call_operand.hbm [shape: f32[16,32], index: 5, kind: input, shape index: {}]   ;;  %s1995_s6 = inlined_call_operand.vmem [shape: f32[32,32], index: 6, kind: input, shape index: {}]   ;;  %s1996_s7 = inlined_call_operand.vmem [shape: f32[32,32], index: 7, kind: input, shape index: {}]   ;;  %s1997_s8 = inlined_call_operand.vmem [shape: f32[16,32], index: 8, kind: input, shape index: {}]   ;;  %s1998_s9 = inlined_call_operand.vmem [shape: f32[24,32], index: 9, kind: input, shape index: {}]   ;;  %s1999_s10 = inlined_call_operand.vmem [shape: f32[32,32], index: 10, kind: input, shape index: {}]   ;;  %s2000_s11 = inlined_call_operand.vmem [shape: f32[32,32], index: 11, kind: input, shape index: {}]   ;;  %s2001_s12 = inlined_call_operand.vmem [shape: f32[32,4], index: 12, kind: input, shape index: {}]   ;;  %s2002_s13 = inlined_call_operand.hbm [shape: f32[32,32], index: 13, kind: output, shape index: {0}]   ;;  %s2003_s14 = inlined_call_operand.vmem [shape: f32[32,4], index: 14, kind: output, shape index: {1}]  }
   0x1   :  { %21 = vsyncpa [#allocation4], 0  ;;  %s1623_s28 = smov [#allocation2]   ;;  %s1575_s16 = scalar_lea.hbm %s1994_s5, 256 }
   0x2   :  { %s37_s29 = sshll.u32 %s1623_s28, 4  ;;  %p1576_p0 = scmp.ne.s32.totalorder %s1994_s5, %s1575_s16  ;;  %s38_s29 = int_to_ptr.vmem [resolvable:$true] %s37_s29 }
   0x3   :  { %p1579_p1 = scmp.lt.u32.totalorder %s1575_s16, %s1994_s5 }
   0x5   :  { %p1581_p2 = pnand %p1579_p1, %p1576_p0 }
   0x7   :  { %1584 = shalt.err (!%p1581_p2)
}
   0x8   :  { %s1585_s20 = scalar_lea.vmem %s38_s29, 256  ;;  %p1590_p4 = scmp.lt.s32.totalorder %s38_s29, %s38_s29 }
   0x9   :  { %p1586_p3 = scmp.ne.s32.totalorder %s38_s29, %s1585_s20  ;;  %p1591_p5 = scmp.lt.s32.totalorder %s1585_s20, %s1585_s20 }
   0xb   :  { %p1592_p6 = por %p1591_p5, %p1590_p4 }
   0xd   :  { %p1593_p7 = pnand %p1592_p6, %p1586_p3 }
   0xf   :  { %1596 = shalt.err (!%p1593_p7)
}
  0x10   :  { %s1624_s21 = smov 128   ;;  %s1625_s22 = smov 8  }
  0x11   :  { %43 = dma.hbm_to_vmem [thread:$0]  %s1994_s5, 256, %s38_s29, [#allocation3], %s1624_s21, %s1624_s21, %s1625_s22  }
  0x12   :  { %1619 = dma.done.wait [#allocation3], 256  }
  0x13   :  { %1620 = vsyncadd [#allocation3], 4294967040  ;;  %vm76_vm0 = vcmask 130048   ;;  %v74_v0 = vld [vmem:[%s1997_s8] sm:$0xff]  ;;  %v75_v1 = vld [vmem:[%s1997_s8 + $0x8] sm:$0xff]  ;;  %vm292_vm1 = vcmask 195584  }
  0x14   :  { %v1726_v2 = vld [vmem:[%s1990_s1] sm:$0xff]  ;;  %v1469_v3 = vpack.c.bf16 %v75_v1, %v74_v0  ;;  %v397_v5 = vld [vmem:[%s1998_s9 + $0x8] sm:$0xff]  ;;  %v1744_v8 = vld [vmem:[%s1990_s1 + $0x10] sm:$0xff]  ;;  %vm490_vm2 = vcmask 261120   ;;  %vm194_vm3 = vcmask 392192   ;;  %vm1117_vm4 = vcmask 31744  }
  0x15   :  { %1325 = vmatprep.mubr.msk.f32.mxu0 %vm76_vm0, %v1726_v2  ;;  %v396_v4 = vld [vmem:[%s1998_s9] sm:$0xff]  ;;  %v1739_v7 = vld [vmem:[%s1990_s1 + $0x8] sm:$0xff]  ;;  %v398_v9 = vld [vmem:[%s1998_s9 + $0x10] sm:$0xff] }
  0x16   :  { %v1489_v6 = vpack.c.bf16 %v397_v5, %v396_v4  ;;  %1470 = vmatprep.subr.bf16.mxu0 %v1469_v3  ;;  %v1756_v10 = vld [vmem:[%s1990_s1 + $0x18] sm:$0xff]  ;;  %v1761_v11 = vld [vmem:[%s1990_s1 + $0x20] sm:$0xff]  ;;  %v1770_v12 = vld [vmem:[%s1990_s1 + $0x28] sm:$0xff] }
  0x17   :  { %1472 = vmatpush3.bf16.msra.mxu0 %v1469_v3  ;;  %v61_v13 = vld [vmem:[%s1989_s0] sm:$0xff]  ;;  %v1781_v14 = vld [vmem:[%s1989_s0 + $0x8] sm:$0xff]  ;;  %v1786_v15 = vld [vmem:[%s1989_s0 + $0x10] sm:$0xff] }
  0x18   :  { %1490 = vmatprep.subr.bf16.mxu0 %v1489_v6  ;;  %v1795_v16 = vld [vmem:[%s1989_s0 + $0x18] sm:$0xff]  ;;  %v484_v17 = vld [vmem:[%s1992_s3] sm:$0xff]  ;;  %v72_v26 = vld [vmem:[%s1993_s4 + $0x8] sm:$0xff] }
  0x19   :  { %v1806_v18 = vld [vmem:[%s1991_s2] sm:$0xff]  ;;  %v1819_v33 = vld [vmem:[%s1991_s2 + $0x8] sm:$0xff]  ;;  %v1824_v35 = vld [vmem:[%s1991_s2 + $0x10] sm:$0xff] }
  0x1a   :  { %1326 = vmatmul.mubr.msk.f32.vlgmr.msra.gmra.mrb[0].mxu0 %vm76_vm0, %v1739_v7  ;;  %1346 = vmatprep.mubr.msk.f32.mxu1 %vm194_vm3, %v1806_v18  ;;  %v71_v25 = vld [vmem:[%s1993_s4] sm:$0xff]  ;;  %v395_v37 = vld [vmem:[#allocation2 + $0x8] sm:$0xff]  ;;  %v73_v39 = vld [vmem:[%s1993_s4 + $0x10] sm:$0xff] }
  0x1b   :  { %1492 = vmatpush3.bf16.msra.mxu0 %v1489_v6  ;;  %1328 = vmatprep.mubr.msk.f32.mxu0 %vm76_vm0, %v1744_v8  ;;  %v1485_v30 = vpack.c.bf16 %v72_v26, %v71_v25  ;;  %v394_v36 = vld [vmem:[#allocation2] sm:$0xff]  ;;  %v710_v41 = vld [vmem:[%s1999_s10 + $0x8] sm:$0xff]  ;;  %v1842_v43 = vld [vmem:[%s1991_s2 + $0x18] sm:$0xff] }
  0x1c   :  { %1368 = vmatprep.subr.mxu0 %v398_v9  ;;  %v709_v40 = vld [vmem:[%s1999_s10] sm:$0xff]  ;;  %v1501_v45 = vpack.c.bf16 %v395_v37, %v394_v36  ;;  %v485_v47 = vld [vmem:[%s1992_s3 + $0x8] sm:$0xff]  ;;  %v486_v48 = vld [vmem:[%s1992_s3 + $0x10] sm:$0xff] }
  0x1d   :  { %v1505_v46 = vpack.c.bf16 %v710_v41, %v709_v40  ;;  %v487_v49 = vld [vmem:[%s1992_s3 + $0x18] sm:$0xff]  ;;  %v488_v50 = vld [vmem:[%s1992_s3 + $0x20] sm:$0xff]  ;;  %v489_v51 = vld [vmem:[%s1992_s3 + $0x28] sm:$0xff] }
  0x1e   :  { %1329 = vmatmul.mubr.msk.f32.gmra.mrb[2].mxu0 %vm76_vm0, %v1756_v10  ;;  %v711_v52 = vld [vmem:[%s1999_s10 + $0x10] sm:$0xff]  ;;  %v712_v53 = vld [vmem:[%s1999_s10 + $0x18] sm:$0xff] }
  0x1f   :  { %1331 = vmatprep.mubr.msk.f32.mxu0 %vm76_vm0, %v1761_v11  ;;  %1369 = vmatpush3.msra.mxu0 %v398_v9  ;;  %v1509_v54 = vpack.c.bf16 %v712_v53, %v711_v52  ;;  %v1018_v9 = vld [vmem:[%s2001_s12 + $0x10] sm:$0xff]  ;;  %v708_v26 = vld [vmem:[%s1995_s6 + $0x18] sm:$0xff] }
  0x20   :  { %v707_v25 = vld [vmem:[%s1995_s6 + $0x10] sm:$0xff] }
  0x22   :  { %1332 = vmatmul.mubr.msk.f32.gmra.mrb[4].mxu0 %vm76_vm0, %v1770_v12 }
  0x23   :  { %1370 = vmatprep.mubr.msk.f32.mxu0 %vm292_vm1, %v61_v13 }
  0x26   :  { %1371 = vmatmul.mubr.msk.f32.vlgmr.msra.gmra.mrb[6].mxu0 %vm292_vm1, %v1781_v14 }
  0x27   :  { %1373 = vmatprep.mubr.msk.f32.mxu0 %vm292_vm1, %v1786_v15 }
  0x2a   :  { %1374 = vmatmul.mubr.msk.f32.gmra.mrb[8].mxu0 %vm292_vm1, %v1795_v16 }
  0x2b   :  { %1384 = vmatprep.mubr.msk.f32.mxu0 %vm490_vm2, %v484_v17 }
  0xed   :  { %v1327_v19 = vpop.f32.mrb[0].mxu0 }
  0xee   :  { %v161_v20 = vpop.f32.mrb[1].mxu0 }
  0xef   :  { %v1473_v21 = vpack.c.bf16 %v1327_v19, %v161_v20  ;;  %v705_v19 = vld [vmem:[%s1995_s6] sm:$0xff]  ;;  %v706_v20 = vld [vmem:[%s1995_s6 + $0x8] sm:$0xff]  ;;  %s1626_s6 = smov [#allocation5]  }
  0xf0   :  { %s1171_s17 = sshll.u32 %s1626_s6, 4  ;;  %s1172_s17 = int_to_ptr.vmem [resolvable:$true] %s1171_s17 }
  0xf1   :  { %v1330_v22 = vpop.f32.mrb[2].mxu0  ;;  %1474 = vmatprep.subr.bf16.mxu1 %v1473_v21  ;;  %s1597_s11 = scalar_lea.vmem %s1172_s17, 512  ;;  %p1602_p9 = scmp.lt.s32.totalorder %s1172_s17, %s1172_s17 }
  0xf2   :  { %v171_v23 = vpop.f32.mrb[3].mxu0  ;;  %1476 = vmatpush3.bf16.msra.mxu1 %v1473_v21  ;;  %p1598_p8 = scmp.ne.s32.totalorder %s1172_s17, %s1597_s11  ;;  %p1603_p10 = scmp.lt.s32.totalorder %s1597_s11, %s1597_s11 }
  0xf3   :  { %v1477_v24 = vpack.c.bf16 %v1330_v22, %v171_v23 }
  0xf4   :  { %p1604_p11 = por %p1603_p10, %p1602_p9 }
  0xf5   :  { %v1333_v27 = vpop.f32.mrb[4].mxu0  ;;  %1478 = vmatprep.subr.bf16.mxu1 %v1477_v24 }
  0xf6   :  { %v181_v28 = vpop.f32.mrb[5].mxu0  ;;  %1480 = vmatpush3.bf16.msra.mxu1 %v1477_v24  ;;  %v1525_v24 = vpack.c.bf16 %v706_v20, %v705_v19  ;;  %p1605_p12 = pnand %p1604_p11, %p1598_p8 }
  0xf7   :  { %v1481_v29 = vpack.c.bf16 %v1333_v27, %v181_v28  ;;  %v1529_v27 = vpack.c.bf16 %v708_v26, %v707_v25 }
  0xf9   :  { %1482 = vmatprep.subr.bf16.mxu1 %v1481_v29  ;;  %v1372_v31 = vpop.f32.mrb[6].mxu0 }
  0xfa   :  { %1484 = vmatpush3.bf16.msra.mxu1 %v1481_v29  ;;  %v465_v32 = vpop.f32.mrb[7].mxu0 }
  0xfb   :  { %v1493_v34 = vpack.c.bf16 %v1372_v31, %v465_v32  ;;  %1486 = vmatprep.subr.bf16.mxu1 %v1485_v30 }
  0xfd   :  { %v1375_v38 = vpop.f32.mrb[8].mxu0  ;;  %1494 = vmatprep.subr.bf16.mxu0 %v1493_v34  ;;  %1347 = vmatmul.mubr.msk.f32.vlgmr.msra.gmra.mrb[0].mxu1 %vm194_vm3, %v1819_v33 }
  0xfe   :  { %v475_v42 = vpop.f32.mrb[9].mxu0  ;;  %1496 = vmatpush3.bf16.msra.mxu0 %v1493_v34  ;;  %1349 = vmatprep.mubr.msk.f32.mxu1 %vm194_vm3, %v1824_v35 }
  0xff   :  { %v1497_v44 = vpack.c.bf16 %v1375_v38, %v475_v42  ;;  %1488 = vmatpush3.bf16.msra.mxu1 %v1485_v30 }
 0x100   :  { %1356 = vmatprep.subr.mxu1 %v73_v39 }
 0x101   :  { %1498 = vmatprep.subr.bf16.mxu0 %v1497_v44  ;;  %1350 = vmatmul.mubr.msk.f32.gmra.mrb[2].mxu1 %vm194_vm3, %v1842_v43 }
 0x102   :  { %1500 = vmatpush3.bf16.msra.mxu0 %v1497_v44  ;;  %1358 = vmatprep.mubr.msk.f32.mxu1 %vm292_vm1, %v61_v13 }
 0x103   :  { %1502 = vmatprep.subr.bf16.mxu0 %v1501_v45  ;;  %1357 = vmatpush3.msra.mxu1 %v73_v39 }
 0x104   :  { %1506 = vmatprep.subr.bf16.mxu1 %v1505_v46 }
 0x105   :  { %1385 = vmatmul.mubr.msk.f32.vlgmr.msra.gmra.mrb[10].mxu0 %vm490_vm2, %v485_v47  ;;  %1359 = vmatmul.mubr.msk.f32.vlgmr.msra.gmra.mrb[0].mxu1 %vm292_vm1, %v1781_v14 }
 0x106   :  { %1504 = vmatpush3.bf16.msra.mxu0 %v1501_v45  ;;  %1387 = vmatprep.mubr.msk.f32.mxu0 %vm490_vm2, %v486_v48 }
 0x107   :  { %1361 = vmatprep.mubr.msk.f32.mxu1 %vm292_vm1, %v1786_v15  ;;  %1508 = vmatpush3.bf16.msra.mxu1 %v1505_v46 }
 0x108   :  { %1510 = vmatprep.subr.bf16.mxu1 %v1509_v54 }
 0x109   :  { %1388 = vmatmul.mubr.msk.f32.gmra.mrb[12].mxu0 %vm490_vm2, %v487_v49  ;;  %1362 = vmatmul.mubr.msk.f32.gmra.mrb[2].mxu1 %vm292_vm1, %v1795_v16 }
 0x10a   :  { %1390 = vmatprep.mubr.msk.f32.mxu0 %vm490_vm2, %v488_v50 }
 0x10b   :  { %1512 = vmatpush3.bf16.msra.mxu1 %v1509_v54 }
 0x10d   :  { %1391 = vmatmul.mubr.msk.f32.gmra.mrb[14].mxu0 %vm490_vm2, %v489_v51 }
 0x10e   :  { %1397 = vmatprep.mubr.msk.f32.mxu0 %vm76_vm0, %v1726_v2 }
 0x111   :  { %1398 = vmatmul.mubr.msk.f32.vlgmr.msra.gmra.mrb[10].mxu0 %vm76_vm0, %v1739_v7  ;;  %v1016_v7 = vld [vmem:[%s2001_s12] sm:$0xff] }
 0x112   :  { %1400 = vmatprep.mubr.msk.f32.mxu0 %vm76_vm0, %v1744_v8  ;;  %v1017_v8 = vld [vmem:[%s2001_s12 + $0x8] sm:$0xff] }
 0x115   :  { %1401 = vmatmul.mubr.msk.f32.gmra.mrb[12].mxu0 %vm76_vm0, %v1756_v10  ;;  %v1533_v10 = vpack.c.bf16 %v1017_v8, %v1016_v7 }
 0x116   :  { %1403 = vmatprep.mubr.msk.f32.mxu0 %vm76_vm0, %v1761_v11  ;;  %v1019_v11 = vld [vmem:[%s2001_s12 + $0x18] sm:$0xff] }
 0x117   :  { %1534 = vmatprep.subr.bf16.mxu0 %v1533_v10 }
 0x118   :  { %1536 = vmatpush3.bf16.msra.mxu0 %v1533_v10 }
 0x119   :  { %1404 = vmatmul.mubr.msk.f32.gmra.mrb[14].mxu0 %vm76_vm0, %v1770_v12  ;;  %v1537_v12 = vpack.c.bf16 %v1019_v11, %v1018_v9 }
 0x11b   :  { %1538 = vmatprep.subr.bf16.mxu0 %v1537_v12 }
 0x11c   :  { %1540 = vmatpush3.bf16.msra.mxu0 %v1537_v12 }
 0x1d8   :  { %v1891_v55 = vpop.f32.mrb[0].mxu1 }
 0x1d9   :  { %v371_v56 = vpop.f32.mrb[1].mxu1  ;;  %v391_v29 = vmax.f32 %v1891_v55, 0.0 }
 0x1da   :  { %v390_v28 = vmax.f32 %v371_v56, 0.0 }
 0x1dc   :  { %v1893_v57 = vpop.f32.mrb[2].mxu1 }
 0x1dd   :  { %v1895_v58 = vpop.f32.mrb[3].mxu1  ;;  %v393_v31 = vmax.f32 %v1893_v57, 0.0 }
 0x1de   :  { %v392_v30 = vmax.f32 %v1895_v58, 0.0 }
 0x1e4   :  { %v1399_v59 = vpop.f32.mrb[10].mxu0 }
 0x1e5   :  { %v670_v60 = vpop.f32.mrb[11].mxu0  ;;  %v700_v62 = vmax.f32 %v1399_v59, 0.0 }
 0x1e6   :  { %v699_v61 = vmax.f32 %v670_v60, 0.0 }
 0x1e8   :  { %v1402_v63 = vpop.f32.mrb[12].mxu0  ;;  %1414 = vmatprep.mubr.msk.f32.mxu1 %vm490_vm2, %v699_v61 }
 0x1e9   :  { %v680_v0 = vpop.f32.mrb[13].mxu0  ;;  %1415 = vmatmul.mubr.msk.f32.vlgmr.msra.gmra.mrb[4].mxu1 %vm490_vm2, %v700_v62  ;;  %v702_v2 = vmax.f32 %v1402_v63, 0.0 }
 0x1ea   :  { %v701_v1 = vmax.f32 %v680_v0, 0.0 }
 0x1ec   :  { %v1405_v3 = vpop.f32.mrb[14].mxu0  ;;  %1417 = vmatprep.mubr.msk.f32.mxu1 %vm490_vm2, %v701_v1 }
 0x1ed   :  { %v690_v4 = vpop.f32.mrb[15].mxu0  ;;  %1418 = vmatmul.mubr.msk.f32.gmra.mrb[6].mxu1 %vm490_vm2, %v702_v2  ;;  %v704_v6 = vmax.f32 %v1405_v3, 0.0 }
 0x1ee   :  { %v703_v5 = vmax.f32 %v690_v4, 0.0 }
 0x1f0   :  { %1420 = vmatprep.mubr.msk.f32.mxu1 %vm490_vm2, %v703_v5 }
 0x1f1   :  { %1421 = vmatmul.mubr.msk.f32.gmra.mrb[8].mxu1 %vm490_vm2, %v704_v6 }
 0x1f2   :  { %1435 = vmatprep.mubr.msk.f32.mxu1 %vm194_vm3, %v1806_v18 }
 0x2bc   :  { %v1416_v13 = vpop.f32.mrb[4].mxu1 }
 0x2bd   :  { %v797_v14 = vpop.f32.mrb[5].mxu1 }
 0x2be   :  { %v1513_v15 = vpack.c.bf16 %v1416_v13, %v797_v14 }
 0x2c0   :  { %v1419_v16 = vpop.f32.mrb[6].mxu1  ;;  %1514 = vmatprep.subr.bf16.mxu1 %v1513_v15 }
 0x2c1   :  { %v807_v17 = vpop.f32.mrb[7].mxu1  ;;  %1516 = vmatpush3.bf16.msra.mxu1 %v1513_v15 }
 0x2c2   :  { %v1517_v18 = vpack.c.bf16 %v1419_v16, %v807_v17 }
 0x2c4   :  { %v1422_v21 = vpop.f32.mrb[8].mxu1  ;;  %1518 = vmatprep.subr.bf16.mxu1 %v1517_v18 }
 0x2c5   :  { %v817_v22 = vpop.f32.mrb[9].mxu1  ;;  %1520 = vmatpush3.bf16.msra.mxu1 %v1517_v18 }
 0x2c6   :  { %v1521_v23 = vpack.c.bf16 %v1422_v21, %v817_v22 }
 0x2c8   :  { %1522 = vmatprep.subr.bf16.mxu1 %v1521_v23 }
 0x2c9   :  { %1524 = vmatpush3.bf16.msra.mxu1 %v1521_v23 }
 0x2ca   :  { %1526 = vmatprep.subr.bf16.mxu1 %v1525_v24 }
 0x2cc   :  { %1436 = vmatmul.mubr.msk.f32.vlgmr.msra.gmra.mrb[10].mxu1 %vm194_vm3, %v1819_v33 }
 0x2cd   :  { %1528 = vmatpush3.bf16.msra.mxu1 %v1525_v24  ;;  %1438 = vmatprep.mubr.msk.f32.mxu1 %vm194_vm3, %v1824_v35 }
 0x2ce   :  { %1530 = vmatprep.subr.bf16.mxu1 %v1529_v27 }
 0x2d0   :  { %1439 = vmatmul.mubr.msk.f32.gmra.mrb[12].mxu1 %vm194_vm3, %v1842_v43 }
 0x2d1   :  { %1532 = vmatpush3.bf16.msra.mxu1 %v1529_v27  ;;  %1449 = vmatprep.mubr.msk.f32.mxu1 %vm490_vm2, %v390_v28 }
 0x2d4   :  { %1450 = vmatmul.mubr.msk.f32.vlgmr.msra.gmra.mrb[10].mxu1 %vm490_vm2, %v391_v29 }
 0x2d5   :  { %1452 = vmatprep.mubr.msk.f32.mxu1 %vm490_vm2, %v392_v30 }
 0x2d8   :  { %1453 = vmatmul.mubr.msk.f32.gmra.mrb[12].mxu1 %vm490_vm2, %v393_v31 }
 0x3a7   :  { %v1451_v32 = vpop.f32.mrb[10].mxu1 }
 0x3a8   :  { %v1009_v33 = vmax.f32 %v1451_v32, 0.0  ;;  %v989_v34 = vpop.f32.mrb[11].mxu1 }
 0x3a9   :  { %v1008_v35 = vmax.f32 %v989_v34, 0.0 }
 0x3aa   :  { %1013 = vst.msk [vmem:[#allocation5 + $0x8] sm:$0xff] %vm490_vm2, %v1009_v33 }
 0x3ab   :  { %1012 = vst.msk [vmem:[#allocation5] sm:$0xff] %vm490_vm2, %v1008_v35  ;;  %v1454_v36 = vpop.f32.mrb[12].mxu1  ;;  %1463 = vmatprep.mubr.msk.f32.mxu0 %vm490_vm2, %v1008_v35 }
 0x3ac   :  { %v1011_v37 = vmax.f32 %v1454_v36, 0.0  ;;  %v999_v38 = vpop.f32.mrb[13].mxu1  ;;  %1464 = vmatmul.mubr.msk.f32.vlgmr.msra.gmra.mrb[16].mxu0 %vm490_vm2, %v1009_v33 }
 0x3ad   :  { %v1010_v39 = vmax.f32 %v999_v38, 0.0 }
 0x3ae   :  { %1015 = vst.msk [vmem:[#allocation5 + $0x18] sm:$0xff] %vm490_vm2, %v1011_v37 }
 0x3af   :  { %1014 = vst.msk [vmem:[#allocation5 + $0x10] sm:$0xff] %vm490_vm2, %v1010_v39  ;;  %1466 = vmatprep.mubr.msk.f32.mxu0 %vm490_vm2, %v1010_v39 }
 0x3b0   :  { %1467 = vmatmul.mubr.msk.f32.gmra.mrb[18].mxu0 %vm490_vm2, %v1011_v37 }
 0x47f   :  { %v1465_v40 = vpop.f32.mrb[16].mxu0 }
 0x480   :  { %v1098_v41 = vpop.f32.mrb[17].mxu0  ;;  %v1121_v45 = vsel %vm1117_vm4, %v1465_v40, -inf }
 0x481   :  { %v1118_v42 = vsel %vm1117_vm4, %v1098_v41, -inf }
 0x482   :  { %1119 = vmax.xlane.f32.xlu0 %v1118_v42 }
 0x483   :  { %v1468_v43 = vpop.f32.mrb[18].mxu0 }
 0x484   :  { %v1108_v44 = vpop.f32.mrb[19].mxu0  ;;  %v1127_v47 = vsel %vm1117_vm4, %v1468_v43, -inf }
 0x485   :  { %v1124_v46 = vsel %vm1117_vm4, %v1108_v44, -inf }
 0x486   :  { %1122 = vmax.xlane.f32.xlu0 %v1121_v45  ;;  %1125 = vmax.xlane.f32.xlu1 %v1124_v46 }
 0x48a   :  { %1128 = vmax.xlane.f32.xlu1 %v1127_v47 }
 0x50f   :  { %v1120_v48 = vpop.xlane.xlu0 %1119 }
 0x510   :  { %v1130_v49 = vsub.f32 %v1098_v41, %v1120_v48 }
 0x512   :  { %v1134_v50 = vmul.f32 1.442695, %v1130_v49 }
 0x513   :  { %v1123_v51 = vpop.xlane.xlu0 %1122  ;;  %v1126_v52 = vpop.xlane.xlu1 %1125 }
 0x514   :  { %1559 = vpow2.f32 %v1134_v50  ;;  %v1131_v53 = vsub.f32 %v1465_v40, %v1123_v51  ;;  %v1132_v54 = vsub.f32 %v1108_v44, %v1126_v52 }
 0x516   :  { %v1136_v55 = vmul.f32 1.442695, %v1131_v53  ;;  %v1138_v56 = vmul.f32 1.442695, %v1132_v54 }
 0x517   :  { %v1129_v57 = vpop.xlane.xlu1 %1128 }
 0x518   :  { %1561 = vpow2.f32 %v1136_v55  ;;  %v1133_v58 = vsub.f32 %v1468_v43, %v1129_v57 }
 0x519   :  { %1563 = vpow2.f32 %v1138_v56 }
 0x51a   :  { %v1140_v59 = vmul.f32 1.442695, %v1133_v58 }
 0x51c   :  { %1565 = vpow2.f32 %v1140_v59 }
 0x51e   :  { %v1560_v60 = vpop.eup %1559 }
 0x51f   :  { %v1142_v61 = vsel %vm1117_vm4, %v1560_v60, 0.0 }
 0x520   :  { %1143 = vadd.xlane.f32.xlu0 %v1142_v61 }
 0x522   :  { %v1562_v62 = vpop.eup %1561 }
 0x523   :  { %v1564_v63 = vpop.eup %1563  ;;  %v1145_v0 = vsel %vm1117_vm4, %v1562_v62, 0.0 }
 0x524   :  { %1146 = vadd.xlane.f32.xlu1 %v1145_v0  ;;  %v1148_v1 = vsel %vm1117_vm4, %v1564_v63, 0.0 }
 0x525   :  { %1149 = vadd.xlane.f32.xlu0 %v1148_v1 }
 0x526   :  { %v1566_v2 = vpop.eup %1565 }
 0x527   :  { %v1151_v3 = vsel %vm1117_vm4, %v1566_v2, 0.0 }
 0x528   :  { %1152 = vadd.xlane.f32.xlu1 %v1151_v3 }
 0x529   :  { %1608 = shalt.err (!%p1605_p12)
}
 0x52a   :  { %s1609_s19 = scalar_lea.hbm %s2002_s13, 512 }
 0x52b   :  { %p1610_p13 = scmp.ne.s32.totalorder %s2002_s13, %s1609_s19  ;;  %p1613_p0 = scmp.lt.u32.totalorder %s1609_s19, %s2002_s13 }
 0x52d   :  { %p1615_p1 = pnand %p1613_p0, %p1610_p13 }
 0x52f   :  { %1618 = shalt.err (!%p1615_p1)
}
 0x530   :  { %1177 = dma.vmem_to_hbm [thread:$0]  %s1172_s17, 512, %s2002_s13, [#allocation4], %s1624_s21, %s1624_s21, %s1625_s22  }
 0x5ad   :  { %v1144_v4 = vpop.xlane.xlu0 %1143 }
 0x5ae   :  { %1567 = vrcp.f32 %v1144_v4 }
 0x5b1   :  { %v1147_v5 = vpop.xlane.xlu1 %1146 }
 0x5b2   :  { %v1150_v6 = vpop.xlane.xlu0 %1149  ;;  %1569 = vrcp.f32 %v1147_v5 }
 0x5b3   :  { %1571 = vrcp.f32 %v1150_v6 }
 0x5b5   :  { %v1153_v7 = vpop.xlane.xlu1 %1152 }
 0x5b6   :  { %1573 = vrcp.f32 %v1153_v7 }
 0x5b8   :  { %v1568_v8 = vpop.eup %1567 }
 0x5b9   :  { %v1155_v9 = vmul.f32 %v1568_v8, %v1560_v60 }
 0x5bb   :  { %1162 = vst.msk [vmem:[%s2003_s14] sm:$0xff] %vm1117_vm4, %v1155_v9 }
 0x5bc   :  { %v1570_v10 = vpop.eup %1569 }
 0x5bd   :  { %v1572_v11 = vpop.eup %1571  ;;  %v1157_v12 = vmul.f32 %v1570_v10, %v1562_v62 }
 0x5be   :  { %v1159_v13 = vmul.f32 %v1572_v11, %v1564_v63 }
 0x5bf   :  { %1163 = vst.msk [vmem:[%s2003_s14 + $0x8] sm:$0xff] %vm1117_vm4, %v1157_v12 }
 0x5c0   :  { %v1574_v14 = vpop.eup %1573  ;;  %1164 = vst.msk [vmem:[%s2003_s14 + $0x10] sm:$0xff] %vm1117_vm4, %v1159_v13 }
 0x5c1   :  { %v1161_v15 = vmul.f32 %v1574_v14, %v1566_v2 }
 0x5c3   :  { %1165 = vst.msk [vmem:[%s2003_s14 + $0x18] sm:$0xff] %vm1117_vm4, %v1161_v15 }
 0x5c4   :  { %1621 = dma.done.wait [#allocation4], 512  }
 0x5c5   :  { %1622 = vsyncadd [#allocation4], 4294966784 }
 0x5c6   :  { %1185 = vsyncpa [#allocation3], 1 }
 0x5c7   :  { %1186 = vsyncpa [#allocation4], 1 }

</bundles_post_ra>
